<compile_context>
chip_gen: v5e
topology: v5e:2x2
jax: 0.10.0
libtpu: 0.0.40
codegen_flags: <defaults>
</compile_context>

<pallas_src>
from functools import partial

import jax
import jax.numpy as jnp
from jax.experimental import pallas as pl
from jax.experimental.pallas import tpu as pltpu


def _round_up(x, m):
    return ((x + m - 1) // m) * m


def _pick_tile(n, candidates=(512, 256, 128)):
    for c in candidates:
        if n % c == 0:
            return c
    return n


def _layernorm_padded(x, gamma, beta, d_valid, eps=1e-5):
    """LayerNorm over the first `d_valid` columns of a zero-padded feature axis.

    Padded columns of x are zero, so sum(x)/d_valid and sum(x^2)/d_valid give the
    exact mean / E[x^2] of the valid region; gamma/beta are zero-padded so padded
    output columns stay exactly zero.
    """
    inv_d = 1.0 / d_valid
    mu = jnp.sum(x, axis=-1, keepdims=True) * inv_d
    ex2 = jnp.sum(x * x, axis=-1, keepdims=True) * inv_d
    var = ex2 - mu * mu
    return (x - mu) * jax.lax.rsqrt(var + eps) * gamma + beta


def attn_cell_kernel(x2_ref, x1_ref, mask_ref,
                     gq_ref, bq_ref, gkv_ref, bkv_ref,
                     wqg_ref, wkv_ref, wo_ref, bg_ref,
                     o_ref, *, num_heads, head_dim, hidden, d_valid, scale):
    bf16 = jnp.bfloat16
    q_in = x2_ref[0]                       # (Lq_t, D_p) f32
    kv_in = x1_ref[0]                      # (Lk,   D_p) f32
    kmask = mask_ref[0]                    # (1, Lk) f32, 1.0 = keep

    # pre-layernorm (f32 on the VPU)
    q_ln = _layernorm_padded(q_in, gq_ref[...], bq_ref[...], d_valid)
    kv_ln = _layernorm_padded(kv_in, gkv_ref[...], bkv_ref[...], d_valid)

    # fused projections: [Q | gate-pre] and [K | V]; bf16 operands, f32 accumulate
    qg = jnp.dot(q_ln.astype(bf16), wqg_ref[...],
                 preferred_element_type=jnp.float32)       # (Lq_t, hidden_p + D_p)
    kv = jnp.dot(kv_ln.astype(bf16), wkv_ref[...],
                 preferred_element_type=jnp.float32)       # (Lk, 2*hidden_p)

    q = qg[:, :hidden]                     # lane-aligned static slices (hidden_p % 128 == 0)
    gate_pre = qg[:, hidden:]
    k = kv[:, :hidden]
    v = kv[:, hidden:]

    lq = q.shape[0]
    lk = k.shape[0]

    # batch-leading per-head layout: (NH, L, head_dim)
    if num_heads == 1:
        q3 = q.reshape(1, lq, head_dim)
        k3 = k.reshape(1, lk, head_dim)
        v3 = v.reshape(1, lk, head_dim)
    else:
        q3 = jnp.transpose(q.reshape(lq, num_heads, head_dim), (1, 0, 2))
        k3 = jnp.transpose(k.reshape(lk, num_heads, head_dim), (1, 0, 2))
        v3 = jnp.transpose(v.reshape(lk, num_heads, head_dim), (1, 0, 2))

    # additive key mask bias, f32, broadcast once for all heads
    bias = ((1.0 - kmask) * (-1e9)).reshape(1, 1, lk)

    # scores for all heads in one MXU call: contract head_dim, batch over heads
    s = jax.lax.dot_general(
        q3.astype(bf16), k3.astype(bf16),
        dimension_numbers=(((2,), (2,)), ((0,), (0,))),
        preferred_element_type=jnp.float32)                # (NH, Lq_t, Lk)
    s = s * scale + bias

    # softmax (f32); divide AFTER the PV matmul
    m = jnp.max(s, axis=-1, keepdims=True)
    p = jnp.exp(s - m)
    denom = jnp.sum(p, axis=-1, keepdims=True)             # (NH, Lq_t, 1)

    ctx = jax.lax.dot_general(
        p.astype(bf16), v3.astype(bf16),
        dimension_numbers=(((2,), (1,)), ((0,), (0,))),
        preferred_element_type=jnp.float32)                # (NH, Lq_t, head_dim)
    ctx = ctx * pl.reciprocal(denom, approx=True)

    if num_heads == 1:
        ctx2 = ctx.reshape(lq, hidden)
    else:
        ctx2 = jnp.transpose(ctx, (1, 0, 2)).reshape(lq, hidden)

    out = jnp.dot(ctx2.astype(bf16), wo_ref[...],
                  preferred_element_type=jnp.float32)      # (Lq_t, D_p)
    gate = jax.nn.sigmoid(gate_pre + bg_ref[...])          # f32
    o_ref[0] = (gate * out).astype(o_ref.dtype)


def attn_cell_forward(x1, x2, params, mask=None, *, num_heads=1):
    """x1: keys/values (B, Lk, D); x2: queries (B, Lq, D); mask: (B, Lk) or None."""
    B, Lk, D = x1.shape
    _, Lq, _ = x2.shape
    hidden = params["wq"].shape[1]
    assert hidden % num_heads == 0
    hd = hidden // num_heads
    scale = 1.0 / (D ** 0.5)

    f32 = jnp.float32
    bf16 = jnp.bfloat16

    # lane-dense padding (128-multiples; use 256 on v6e/v7x if sizes warrant)
    D_p = _round_up(D, 128)
    hd_p = _round_up(hd, 128)
    hidden_p = num_heads * hd_p

    pad_feat = lambda a: jnp.pad(a.astype(f32), ((0, 0), (0, 0), (0, D_p - D)))
    x1_p = pad_feat(x1)
    x2_p = pad_feat(x2)

    if mask is None:
        mask = jnp.ones((B, Lk), f32)
    mask3 = mask.astype(f32).reshape(B, 1, Lk)

    def pad_vec(v):
        return jnp.pad(v.astype(f32), (0, D_p - D)).reshape(1, D_p)

    gq, bq = pad_vec(params["ln_q_gamma"]), pad_vec(params["ln_q_beta"])
    gkv, bkv = pad_vec(params["ln_kv_gamma"]), pad_vec(params["ln_kv_beta"])
    bg = pad_vec(params["bg"])

    def pad_qkv(w):  # (D, hidden) -> (D_p, hidden_p), zero-padded per head
        w = w.astype(f32).reshape(D, num_heads, hd)
        w = jnp.pad(w, ((0, D_p - D), (0, 0), (0, hd_p - hd)))
        return w.reshape(D_p, hidden_p)

    def pad_out(w):  # (hidden, D) -> (hidden_p, D_p)
        w = w.astype(f32).reshape(num_heads, hd, D)
        w = jnp.pad(w, ((0, 0), (0, hd_p - hd), (0, D_p - D)))
        return w.reshape(hidden_p, D_p)

    wq_p, wk_p, wv_p = pad_qkv(params["wq"]), pad_qkv(params["wk"]), pad_qkv(params["wv"])
    wo_p = pad_out(params["wo"])
    wg_p = jnp.pad(params["wg"].astype(f32), ((0, D_p - D), (0, D_p - D)))

    # host-side weight fusion + bf16 storage (halves weight VMEM — v7x friendly)
    wqg = jnp.concatenate([wq_p, wg_p], axis=1).astype(bf16)   # (D_p, hidden_p + D_p)
    wkv = jnp.concatenate([wk_p, wv_p], axis=1).astype(bf16)   # (D_p, 2*hidden_p)
    wo = wo_p.astype(bf16)                                     # (hidden_p, D_p)

    lq_tile = _pick_tile(Lq)
    n_lq = Lq // lq_tile

    kernel = partial(attn_cell_kernel, num_heads=num_heads, head_dim=hd_p,
                     hidden=hidden_p, d_valid=float(D), scale=scale)

    # explicit VMEM budget: double-buffered activation tiles + weights + scratch headroom
    foot = (4 * 2 * (lq_tile * D_p + Lk * D_p + Lk)        # x2/x1/mask tiles (f32, 2 bufs)
            + 4 * 2 * lq_tile * D_p                        # output tile (f32, 2 bufs)
            + 2 * (D_p * (hidden_p + D_p) + D_p * 2 * hidden_p + hidden_p * D_p)  # bf16 weights
            + 4 * 8 * D_p                                  # LN params / bias
            + 4 * (num_heads * lq_tile * Lk + lq_tile * (2 * hidden_p + D_p)))  # live temporaries
    vmem_limit = int(min(64 * 1024 * 1024, max(32 * 1024 * 1024, 4 * foot)))

    out_p = pl.pallas_call(
        kernel,
        out_shape=jax.ShapeDtypeStruct((B, Lq, D_p), x2.dtype),
        grid=(B, n_lq),
        in_specs=[
            pl.BlockSpec((1, lq_tile, D_p), lambda b, t: (b, t, 0)),    # x2 (queries)
            pl.BlockSpec((1, Lk, D_p), lambda b, t: (b, 0, 0)),         # x1 (keys/values)
            pl.BlockSpec((1, 1, Lk), lambda b, t: (b, 0, 0)),           # key mask
            pl.BlockSpec((1, D_p), lambda b, t: (0, 0)),                # LN q gamma
            pl.BlockSpec((1, D_p), lambda b, t: (0, 0)),                # LN q beta
            pl.BlockSpec((1, D_p), lambda b, t: (0, 0)),                # LN kv gamma
            pl.BlockSpec((1, D_p), lambda b, t: (0, 0)),                # LN kv beta
            pl.BlockSpec((D_p, hidden_p + D_p), lambda b, t: (0, 0)),   # [Wq | Wg]
            pl.BlockSpec((D_p, 2 * hidden_p), lambda b, t: (0, 0)),     # [Wk | Wv]
            pl.BlockSpec((hidden_p, D_p), lambda b, t: (0, 0)),         # Wo
            pl.BlockSpec((1, D_p), lambda b, t: (0, 0)),                # bg
        ],
        out_specs=pl.BlockSpec((1, lq_tile, D_p), lambda b, t: (b, t, 0)),
        compiler_params=pltpu.CompilerParams(
            dimension_semantics=("parallel", "parallel"),
            vmem_limit_bytes=vmem_limit),
    )(x2_p, x1_p, mask3, gq, bq, gkv, bkv, wqg, wkv, wo, bg)

    return out_p[:, :, :D]


def attn_cell_reference(x1, x2, params, mask=None, *, num_heads=1):
    """Pure-JAX f32 reference for validation."""
    B, Lk, D = x1.shape
    hidden = params["wq"].shape[1]
    hd = hidden // num_heads
    scale = 1.0 / (D ** 0.5)
    if mask is None:
        mask = jnp.ones((B, Lk), jnp.float32)

    def ln(x, g, b, eps=1e-5):
        mu = jnp.mean(x, -1, keepdims=True)
        var = jnp.mean((x - mu) ** 2, -1, keepdims=True)
        return (x - mu) * jax.lax.rsqrt(var + eps) * g + b

    q_ln = ln(x2, params["ln_q_gamma"], params["ln_q_beta"])
    kv_ln = ln(x1, params["ln_kv_gamma"], params["ln_kv_beta"])
    q = q_ln @ params["wq"]
    k = kv_ln @ params["wk"]
    v = kv_ln @ params["wv"]
    qh = q.reshape(B, -1, num_heads, hd).transpose(0, 2, 1, 3)
    kh = k.reshape(B, Lk, num_heads, hd).transpose(0, 2, 1, 3)
    vh = v.reshape(B, Lk, num_heads, hd).transpose(0, 2, 1, 3)
    s = scale * jnp.einsum('bhqd,bhkd->bhqk', qh, kh)
    s = s + (1.0 - mask[:, None, None, :]) * (-1e9)
    p = jax.nn.softmax(s, axis=-1)
    ctx = jnp.einsum('bhqk,bhkd->bhqd', p, vh).transpose(0, 2, 1, 3).reshape(B, -1, hidden)
    out = ctx @ params["wo"]
    gate = jax.nn.sigmoid(q_ln @ params["wg"] + params["bg"])
    return gate * out


def init_params(key, input_dim, hidden_dim):
    ks = jax.random.split(key, 6)
    s = 0.02
    return {
        "ln_q_gamma": jnp.ones((input_dim,), jnp.float32),
        "ln_q_beta": jnp.zeros((input_dim,), jnp.float32),
        "ln_kv_gamma": jnp.ones((input_dim,), jnp.float32),
        "ln_kv_beta": jnp.zeros((input_dim,), jnp.float32),
        "wq": s * jax.random.normal(ks[0], (input_dim, hidden_dim), jnp.float32),
        "wk": s * jax.random.normal(ks[1], (input_dim, hidden_dim), jnp.float32),
        "wv": s * jax.random.normal(ks[2], (input_dim, hidden_dim), jnp.float32),
        "wo": s * jax.random.normal(ks[3], (hidden_dim, input_dim), jnp.float32),
        "wg": s * jax.random.normal(ks[4], (input_dim, input_dim), jnp.float32),
        "bg": jnp.zeros((input_dim,), jnp.float32),
    }


if __name__ == "__main__":
    B, L, D, H, NH = 2, 8, 32, 32, 1   # batch, seq, input_dim, hidden_dim, num_heads

    key = jax.random.PRNGKey(0)
    k1, k2, kp = jax.random.split(key, 3)
    x1 = jax.random.normal(k1, (B, L, D), jnp.float32)   # keys / values
    x2 = jax.random.normal(k2, (B, L, D), jnp.float32)   # queries
    params = init_params(kp, D, H)

    o = attn_cell_forward(x1, x2, params, mask=None, num_heads=NH)
    o = jax.block_until_ready(o)
    assert o.shape == (B, L, D)
    assert bool(jnp.all(jnp.isfinite(o)))

    ref = attn_cell_reference(x1, x2, params, mask=None, num_heads=NH)
    err = float(jnp.max(jnp.abs(o - ref)))
    ref_scale = float(jnp.max(jnp.abs(ref))) + 1e-6
    # loose bound: bf16 MXU operands vs f32 reference
    assert err <= 0.05 * ref_scale + 1e-4, (err, ref_scale)

    print("KERNEL_OK")
</pallas_src>

<mosaic_0001>
module attributes {stable_mosaic.version = 11 : i64} {
  func.func @attn_cell_kernel(%arg0: i32, %arg1: i32, %arg2: memref<1x8x128xf32, #tpu.memory_space<vmem>>, %arg3: memref<1x8x128xf32, #tpu.memory_space<vmem>>, %arg4: memref<1x1x8xf32, #tpu.memory_space<vmem>>, %arg5: memref<1x128xf32, #tpu.memory_space<vmem>>, %arg6: memref<1x128xf32, #tpu.memory_space<vmem>>, %arg7: memref<1x128xf32, #tpu.memory_space<vmem>>, %arg8: memref<1x128xf32, #tpu.memory_space<vmem>>, %arg9: memref<128x256xbf16, #tpu.memory_space<vmem>>, %arg10: memref<128x256xbf16, #tpu.memory_space<vmem>>, %arg11: memref<128x128xbf16, #tpu.memory_space<vmem>>, %arg12: memref<1x128xf32, #tpu.memory_space<vmem>>, %arg13: memref<1x8x128xf32, #tpu.memory_space<vmem>>) attributes {dimension_semantics = [#tpu.dimension_semantics<parallel>, #tpu.dimension_semantics<parallel>], iteration_bounds = array<i64: 2, 1>, scalar_prefetch = 0 : i64, scratch_operands = 0 : i64, tpu.core_type = #tpu.core_type<tc>, window_params = [{transform_indices = @transform_0, window_bounds = array<i64: 1, 8, 128>}, {transform_indices = @transform_1, window_bounds = array<i64: 1, 8, 128>}, {transform_indices = @transform_2, window_bounds = array<i64: 1, 1, 8>}, {pipeline_mode = #tpu.pipeline_mode<synchronous>, transform_indices = @transform_3, window_bounds = array<i64: 1, 128>}, {pipeline_mode = #tpu.pipeline_mode<synchronous>, transform_indices = @transform_4, window_bounds = array<i64: 1, 128>}, {pipeline_mode = #tpu.pipeline_mode<synchronous>, transform_indices = @transform_5, window_bounds = array<i64: 1, 128>}, {pipeline_mode = #tpu.pipeline_mode<synchronous>, transform_indices = @transform_6, window_bounds = array<i64: 1, 128>}, {pipeline_mode = #tpu.pipeline_mode<synchronous>, transform_indices = @transform_7, window_bounds = array<i64: 128, 256>}, {pipeline_mode = #tpu.pipeline_mode<synchronous>, transform_indices = @transform_8, window_bounds = array<i64: 128, 256>}, {pipeline_mode = #tpu.pipeline_mode<synchronous>, transform_indices = @transform_9, window_bounds = array<i64: 128, 128>}, {pipeline_mode = #tpu.pipeline_mode<synchronous>, transform_indices = @transform_10, window_bounds = array<i64: 1, 128>}, {transform_indices = @transform_11, window_bounds = array<i64: 1, 8, 128>}]} {
    %c0 = arith.constant 0 : index
    %c0_0 = arith.constant 0 : index
    %c0_1 = arith.constant 0 : index
    %0 = vector.load %arg2[%c0, %c0_0, %c0_1] : memref<1x8x128xf32, #tpu.memory_space<vmem>>, vector<1x8x128xf32>
    %1 = vector.shape_cast %0 : vector<1x8x128xf32> to vector<8x128xf32>
    %c0_2 = arith.constant 0 : index
    %c0_3 = arith.constant 0 : index
    %c0_4 = arith.constant 0 : index
    %2 = vector.load %arg3[%c0_2, %c0_3, %c0_4] : memref<1x8x128xf32, #tpu.memory_space<vmem>>, vector<1x8x128xf32>
    %3 = vector.shape_cast %2 : vector<1x8x128xf32> to vector<8x128xf32>
    %c0_5 = arith.constant 0 : index
    %c0_6 = arith.constant 0 : index
    %c0_7 = arith.constant 0 : index
    %4 = vector.load %arg4[%c0_5, %c0_6, %c0_7] : memref<1x1x8xf32, #tpu.memory_space<vmem>>, vector<1x1x8xf32>
    %5 = vector.shape_cast %4 : vector<1x1x8xf32> to vector<1x8xf32>
    %c0_8 = arith.constant 0 : index
    %c0_9 = arith.constant 0 : index
    %6 = vector.load %arg5[%c0_8, %c0_9] : memref<1x128xf32, #tpu.memory_space<vmem>>, vector<1x128xf32>
    %c0_10 = arith.constant 0 : index
    %c0_11 = arith.constant 0 : index
    %7 = vector.load %arg6[%c0_10, %c0_11] : memref<1x128xf32, #tpu.memory_space<vmem>>, vector<1x128xf32>
    %cst = arith.constant dense<0.000000e+00> : vector<8xf32>
    %8 = vector.multi_reduction <add>, %1, %cst [1] : vector<8x128xf32> to vector<8xf32>
    %9 = vector.shape_cast %8 : vector<8xf32> to vector<8x1xf32>
    %cst_12 = arith.constant 3.125000e-02 : f32
    %10 = vector.broadcast %cst_12 : f32 to vector<8x1xf32>
    %11 = arith.mulf %9, %10 : vector<8x1xf32>
    %12 = arith.mulf %1, %1 : vector<8x128xf32>
    %cst_13 = arith.constant dense<0.000000e+00> : vector<8xf32>
    %13 = vector.multi_reduction <add>, %12, %cst_13 [1] : vector<8x128xf32> to vector<8xf32>
    %14 = vector.shape_cast %13 : vector<8xf32> to vector<8x1xf32>
    %cst_14 = arith.constant 3.125000e-02 : f32
    %15 = vector.broadcast %cst_14 : f32 to vector<8x1xf32>
    %16 = arith.mulf %14, %15 : vector<8x1xf32>
    %17 = arith.mulf %11, %11 : vector<8x1xf32>
    %18 = arith.subf %16, %17 : vector<8x1xf32>
    %19 = vector.broadcast %11 : vector<8x1xf32> to vector<8x128xf32>
    %20 = arith.subf %1, %19 : vector<8x128xf32>
    %cst_15 = arith.constant 9.99999974E-6 : f32
    %21 = vector.broadcast %cst_15 : f32 to vector<8x1xf32>
    %22 = arith.addf %18, %21 : vector<8x1xf32>
    %23 = math.rsqrt %22 : vector<8x1xf32>
    %24 = vector.broadcast %23 : vector<8x1xf32> to vector<8x128xf32>
    %25 = arith.mulf %20, %24 : vector<8x128xf32>
    %26 = vector.broadcast %6 : vector<1x128xf32> to vector<8x128xf32>
    %27 = arith.mulf %25, %26 : vector<8x128xf32>
    %28 = vector.broadcast %7 : vector<1x128xf32> to vector<8x128xf32>
    %29 = arith.addf %27, %28 : vector<8x128xf32>
    %c0_16 = arith.constant 0 : index
    %c0_17 = arith.constant 0 : index
    %30 = vector.load %arg7[%c0_16, %c0_17] : memref<1x128xf32, #tpu.memory_space<vmem>>, vector<1x128xf32>
    %c0_18 = arith.constant 0 : index
    %c0_19 = arith.constant 0 : index
    %31 = vector.load %arg8[%c0_18, %c0_19] : memref<1x128xf32, #tpu.memory_space<vmem>>, vector<1x128xf32>
    %cst_20 = arith.constant dense<0.000000e+00> : vector<8xf32>
    %32 = vector.multi_reduction <add>, %3, %cst_20 [1] : vector<8x128xf32> to vector<8xf32>
    %33 = vector.shape_cast %32 : vector<8xf32> to vector<8x1xf32>
    %cst_21 = arith.constant 3.125000e-02 : f32
    %34 = vector.broadcast %cst_21 : f32 to vector<8x1xf32>
    %35 = arith.mulf %33, %34 : vector<8x1xf32>
    %36 = arith.mulf %3, %3 : vector<8x128xf32>
    %cst_22 = arith.constant dense<0.000000e+00> : vector<8xf32>
    %37 = vector.multi_reduction <add>, %36, %cst_22 [1] : vector<8x128xf32> to vector<8xf32>
    %38 = vector.shape_cast %37 : vector<8xf32> to vector<8x1xf32>
    %cst_23 = arith.constant 3.125000e-02 : f32
    %39 = vector.broadcast %cst_23 : f32 to vector<8x1xf32>
    %40 = arith.mulf %38, %39 : vector<8x1xf32>
    %41 = arith.mulf %35, %35 : vector<8x1xf32>
    %42 = arith.subf %40, %41 : vector<8x1xf32>
    %43 = vector.broadcast %35 : vector<8x1xf32> to vector<8x128xf32>
    %44 = arith.subf %3, %43 : vector<8x128xf32>
    %cst_24 = arith.constant 9.99999974E-6 : f32
    %45 = vector.broadcast %cst_24 : f32 to vector<8x1xf32>
    %46 = arith.addf %42, %45 : vector<8x1xf32>
    %47 = math.rsqrt %46 : vector<8x1xf32>
    %48 = vector.broadcast %47 : vector<8x1xf32> to vector<8x128xf32>
    %49 = arith.mulf %44, %48 : vector<8x128xf32>
    %50 = vector.broadcast %30 : vector<1x128xf32> to vector<8x128xf32>
    %51 = arith.mulf %49, %50 : vector<8x128xf32>
    %52 = vector.broadcast %31 : vector<1x128xf32> to vector<8x128xf32>
    %53 = arith.addf %51, %52 : vector<8x128xf32>
    %54 = arith.truncf %29 : vector<8x128xf32> to vector<8x128xbf16>
    %c0_25 = arith.constant 0 : index
    %c0_26 = arith.constant 0 : index
    %55 = vector.load %arg9[%c0_25, %c0_26] : memref<128x256xbf16, #tpu.memory_space<vmem>>, vector<128x256xbf16>
    %cst_27 = arith.constant dense<0.000000e+00> : vector<8x256xf32>
    %56 = tpu.matmul %54, %55, %cst_27 {dimension_numbers = #tpu.dot_dimension_numbers<[1], [0], [0], [1], [0, 0, 1, 1], [], []>} : vector<8x128xbf16>, vector<128x256xbf16>, vector<8x256xf32> -> vector<8x256xf32>
    %57 = arith.truncf %53 : vector<8x128xf32> to vector<8x128xbf16>
    %c0_28 = arith.constant 0 : index
    %c0_29 = arith.constant 0 : index
    %58 = vector.load %arg10[%c0_28, %c0_29] : memref<128x256xbf16, #tpu.memory_space<vmem>>, vector<128x256xbf16>
    %cst_30 = arith.constant dense<0.000000e+00> : vector<8x256xf32>
    %59 = tpu.matmul %57, %58, %cst_30 {dimension_numbers = #tpu.dot_dimension_numbers<[1], [0], [0], [1], [0, 0, 1, 1], [], []>} : vector<8x128xbf16>, vector<128x256xbf16>, vector<8x256xf32> -> vector<8x256xf32>
    %60 = vector.extract_strided_slice %56 {offsets = [0, 0], sizes = [8, 128], strides = [1, 1]} : vector<8x256xf32> to vector<8x128xf32>
    %61 = vector.extract_strided_slice %56 {offsets = [0, 128], sizes = [8, 128], strides = [1, 1]} : vector<8x256xf32> to vector<8x128xf32>
    %62 = vector.extract_strided_slice %59 {offsets = [0, 0], sizes = [8, 128], strides = [1, 1]} : vector<8x256xf32> to vector<8x128xf32>
    %63 = vector.extract_strided_slice %59 {offsets = [0, 128], sizes = [8, 128], strides = [1, 1]} : vector<8x256xf32> to vector<8x128xf32>
    %64 = vector.shape_cast %60 : vector<8x128xf32> to vector<1x8x128xf32>
    %65 = vector.shape_cast %62 : vector<8x128xf32> to vector<1x8x128xf32>
    %66 = vector.shape_cast %63 : vector<8x128xf32> to vector<1x8x128xf32>
    %cst_31 = arith.constant 1.000000e+00 : f32
    %67 = vector.broadcast %cst_31 : f32 to vector<1x8xf32>
    %68 = arith.subf %67, %5 : vector<1x8xf32>
    %cst_32 = arith.constant -1.000000e+09 : f32
    %69 = vector.broadcast %cst_32 : f32 to vector<1x8xf32>
    %70 = arith.mulf %68, %69 : vector<1x8xf32>
    %71 = vector.shape_cast %70 : vector<1x8xf32> to vector<1x1x8xf32>
    %72 = arith.truncf %64 : vector<1x8x128xf32> to vector<1x8x128xbf16>
    %73 = arith.truncf %65 : vector<1x8x128xf32> to vector<1x8x128xbf16>
    %cst_33 = arith.constant dense<0.000000e+00> : vector<1x8x8xf32>
    %74 = tpu.matmul %72, %73, %cst_33 {dimension_numbers = #tpu.dot_dimension_numbers<[2], [2], [1], [1], [0, 0, 0, 1, 1, 1], [0], [0]>} : vector<1x8x128xbf16>, vector<1x8x128xbf16>, vector<1x8x8xf32> -> vector<1x8x8xf32>
    %cst_34 = arith.constant 0.176776692 : f32
    %75 = vector.broadcast %cst_34 : f32 to vector<1x8x8xf32>
    %76 = arith.mulf %74, %75 : vector<1x8x8xf32>
    %77 = vector.broadcast %71 : vector<1x1x8xf32> to vector<1x8x8xf32>
    %78 = arith.addf %76, %77 : vector<1x8x8xf32>
    %cst_35 = arith.constant dense<0xFF800000> : vector<1x8xf32>
    %79 = vector.multi_reduction <maximumf>, %78, %cst_35 [2] : vector<1x8x8xf32> to vector<1x8xf32>
    %80 = vector.shape_cast %79 : vector<1x8xf32> to vector<1x8x1xf32>
    %81 = vector.broadcast %80 : vector<1x8x1xf32> to vector<1x8x8xf32>
    %82 = arith.subf %78, %81 : vector<1x8x8xf32>
    %83 = math.exp %82 : vector<1x8x8xf32>
    %cst_36 = arith.constant dense<0.000000e+00> : vector<1x8xf32>
    %84 = vector.multi_reduction <add>, %83, %cst_36 [2] : vector<1x8x8xf32> to vector<1x8xf32>
    %85 = vector.shape_cast %84 : vector<1x8xf32> to vector<1x8x1xf32>
    %86 = arith.truncf %83 : vector<1x8x8xf32> to vector<1x8x8xbf16>
    %87 = arith.truncf %66 : vector<1x8x128xf32> to vector<1x8x128xbf16>
    %cst_37 = arith.constant dense<0.000000e+00> : vector<1x8x128xf32>
    %88 = tpu.matmul %86, %87, %cst_37 {dimension_numbers = #tpu.dot_dimension_numbers<[2], [1], [1], [2], [0, 0, 0, 1, 1, 2], [0], [0]>} : vector<1x8x8xbf16>, vector<1x8x128xbf16>, vector<1x8x128xf32> -> vector<1x8x128xf32>
    %89 = tpu.reciprocal %85 {approx = true} : vector<1x8x1xf32> -> vector<1x8x1xf32>
    %90 = vector.broadcast %89 : vector<1x8x1xf32> to vector<1x8x128xf32>
    %91 = arith.mulf %88, %90 : vector<1x8x128xf32>
    %92 = vector.shape_cast %91 : vector<1x8x128xf32> to vector<8x128xf32>
    %93 = arith.truncf %92 : vector<8x128xf32> to vector<8x128xbf16>
    %c0_38 = arith.constant 0 : index
    %c0_39 = arith.constant 0 : index
    %94 = vector.load %arg11[%c0_38, %c0_39] : memref<128x128xbf16, #tpu.memory_space<vmem>>, vector<128x128xbf16>
    %cst_40 = arith.constant dense<0.000000e+00> : vector<8x128xf32>
    %95 = tpu.matmul %93, %94, %cst_40 {dimension_numbers = #tpu.dot_dimension_numbers<[1], [0], [0], [1], [0, 0, 1, 1], [], []>} : vector<8x128xbf16>, vector<128x128xbf16>, vector<8x128xf32> -> vector<8x128xf32>
    %c0_41 = arith.constant 0 : index
    %c0_42 = arith.constant 0 : index
    %96 = vector.load %arg12[%c0_41, %c0_42] : memref<1x128xf32, #tpu.memory_space<vmem>>, vector<1x128xf32>
    %97 = vector.broadcast %96 : vector<1x128xf32> to vector<8x128xf32>
    %98 = arith.addf %61, %97 : vector<8x128xf32>
    %99 = arith.negf %98 : vector<8x128xf32>
    %100 = math.exp %99 : vector<8x128xf32>
    %cst_43 = arith.constant 1.000000e+00 : f32
    %101 = vector.broadcast %cst_43 : f32 to vector<8x128xf32>
    %102 = arith.addf %101, %100 : vector<8x128xf32>
    %103 = arith.divf %101, %102 : vector<8x128xf32>
    %104 = arith.mulf %103, %95 : vector<8x128xf32>
    %c0_44 = arith.constant 0 : index
    %c0_45 = arith.constant 0 : index
    %c0_46 = arith.constant 0 : index
    %105 = vector.load %arg13[%c0_44, %c0_45, %c0_46] : memref<1x8x128xf32, #tpu.memory_space<vmem>>, vector<1x8x128xf32>
    %106 = vector.shape_cast %105 : vector<1x8x128xf32> to vector<8x128xf32>
    %107 = vector.shape_cast %104 : vector<8x128xf32> to vector<1x8x128xf32>
    tpu.vector_store %arg13[%c0_44, %c0_45, %c0_46], %107 {strides = array<i32>} : memref<1x8x128xf32, #tpu.memory_space<vmem>>, vector<1x8x128xf32>,
    return
  }
  func.func @transform_0(%arg0: i32, %arg1: i32) -> (i32, i32, i32) {
    %c0_i32 = arith.constant 0 : i32
    %c0_i32_0 = arith.constant 0 : i32
    return %arg0, %arg1, %c0_i32 : i32, i32, i32
  }
  func.func @transform_1(%arg0: i32, %arg1: i32) -> (i32, i32, i32) {
    %c0_i32 = arith.constant 0 : i32
    %c0_i32_0 = arith.constant 0 : i32
    %c0_i32_1 = arith.constant 0 : i32
    return %arg0, %c0_i32, %c0_i32_0 : i32, i32, i32
  }
  func.func @transform_2(%arg0: i32, %arg1: i32) -> (i32, i32, i32) {
    %c0_i32 = arith.constant 0 : i32
    %c0_i32_0 = arith.constant 0 : i32
    %c0_i32_1 = arith.constant 0 : i32
    return %arg0, %c0_i32, %c0_i32_0 : i32, i32, i32
  }
  func.func @transform_3(%arg0: i32, %arg1: i32) -> (i32, i32) {
    %c0_i32 = arith.constant 0 : i32
    %c0_i32_0 = arith.constant 0 : i32
    %c0_i32_1 = arith.constant 0 : i32
    return %c0_i32, %c0_i32_0 : i32, i32
  }
  func.func @transform_4(%arg0: i32, %arg1: i32) -> (i32, i32) {
    %c0_i32 = arith.constant 0 : i32
    %c0_i32_0 = arith.constant 0 : i32
    %c0_i32_1 = arith.constant 0 : i32
    return %c0_i32, %c0_i32_0 : i32, i32
  }
  func.func @transform_5(%arg0: i32, %arg1: i32) -> (i32, i32) {
    %c0_i32 = arith.constant 0 : i32
    %c0_i32_0 = arith.constant 0 : i32
    %c0_i32_1 = arith.constant 0 : i32
    return %c0_i32, %c0_i32_0 : i32, i32
  }
  func.func @transform_6(%arg0: i32, %arg1: i32) -> (i32, i32) {
    %c0_i32 = arith.constant 0 : i32
    %c0_i32_0 = arith.constant 0 : i32
    %c0_i32_1 = arith.constant 0 : i32
    return %c0_i32, %c0_i32_0 : i32, i32
  }
  func.func @transform_7(%arg0: i32, %arg1: i32) -> (i32, i32) {
    %c0_i32 = arith.constant 0 : i32
    %c0_i32_0 = arith.constant 0 : i32
    %c0_i32_1 = arith.constant 0 : i32
    return %c0_i32, %c0_i32_0 : i32, i32
  }
  func.func @transform_8(%arg0: i32, %arg1: i32) -> (i32, i32) {
    %c0_i32 = arith.constant 0 : i32
    %c0_i32_0 = arith.constant 0 : i32
    %c0_i32_1 = arith.constant 0 : i32
    return %c0_i32, %c0_i32_0 : i32, i32
  }
  func.func @transform_9(%arg0: i32, %arg1: i32) -> (i32, i32) {
    %c0_i32 = arith.constant 0 : i32
    %c0_i32_0 = arith.constant 0 : i32
    %c0_i32_1 = arith.constant 0 : i32
    return %c0_i32, %c0_i32_0 : i32, i32
  }
  func.func @transform_10(%arg0: i32, %arg1: i32) -> (i32, i32) {
    %c0_i32 = arith.constant 0 : i32
    %c0_i32_0 = arith.constant 0 : i32
    %c0_i32_1 = arith.constant 0 : i32
    return %c0_i32, %c0_i32_0 : i32, i32
  }
  func.func @transform_11(%arg0: i32, %arg1: i32) -> (i32, i32, i32) {
    %c0_i32 = arith.constant 0 : i32
    %c0_i32_0 = arith.constant 0 : i32
    return %arg0, %arg1, %c0_i32 : i32, i32, i32
  }
}

</mosaic_0001>

<bundles_post_ra>
// kernel: tpu_custom_call.1
= control target key start
LH: loop header
LB: loop body
LE: loop exit
PB: predicated region body
PF: predicated region fallthrough
CT: control target
= control target key end

     0   :  { %s2120_s0 = inlined_call_operand.hbm [shape: f32[2,8,128], index: 0, kind: input, shape index: {}]   ;;  %s2121_s1 = inlined_call_operand.hbm [shape: f32[2,8,128], index: 1, kind: input, shape index: {}]   ;;  %s2122_s2 = inlined_call_operand.hbm [shape: f32[2,1,8], index: 2, kind: input, shape index: {}]   ;;  %s2123_s3 = inlined_call_operand.vmem [shape: f32[1,128], index: 3, kind: input, shape index: {}]   ;;  %s2124_s4 = inlined_call_operand.vmem [shape: f32[1,128], index: 4, kind: input, shape index: {}]   ;;  %s2125_s5 = inlined_call_operand.vmem [shape: f32[1,128], index: 5, kind: input, shape index: {}]   ;;  %s2126_s6 = inlined_call_operand.vmem [shape: f32[1,128], index: 6, kind: input, shape index: {}]   ;;  %s2127_s7 = inlined_call_operand.hbm [shape: bf16[128,256], index: 7, kind: input, shape index: {}]   ;;  %s2128_s8 = inlined_call_operand.hbm [shape: bf16[128,256], index: 8, kind: input, shape index: {}]   ;;  %s2129_s9 = inlined_call_operand.hbm [shape: bf16[128,128], index: 9, kind: input, shape index: {}]   ;;  %s2130_s10 = inlined_call_operand.vmem [shape: f32[1,128], index: 10, kind: input, shape index: {}]   ;;  %s2131_s11 = inlined_call_operand.hbm [shape: f32[2,8,128], index: 11, kind: output, shape index: {}]  }
   0x1   :  { %2144 = sst [smem:[#allocation27_spill]] %s2121_s1 }
   0x2   :  { %2145 = sst [smem:[#allocation28_spill]] %s2124_s4 }
   0x3   :  { %2146 = sst [smem:[#allocation29_spill]] %s2127_s7 }
   0x4   :  { %2147 = sst [smem:[#allocation30_spill]] %s2128_s8 }
   0x5   :  { %2148 = sst [smem:[#allocation31_spill]] %s2129_s9 }
   0x6   :  { %2149 = sst [smem:[#allocation32_spill]] %s2130_s10 }
   0x7   :  { %2150 = sst [smem:[#allocation33_spill]] %s2131_s11 }
   0x8   :  { %16 = vsyncpa [#allocation3], 0 }
   0x9   :  { %18 = vsyncpa [#allocation3 + $0x1], 0 }
   0xa   :  { %19 = vsyncpa [#allocation6], 0 }
   0xb   :  { %21 = vsyncpa [#allocation6 + $0x1], 0 }
   0xc   :  { %22 = vsyncpa [#allocation9], 0 }
   0xd   :  { %23 = vsyncpa [#allocation12], 0 }
   0xe   :  { %24 = vsyncpa [#allocation4], 0 }
   0xf   :  { %26 = vsyncpa [#allocation4 + $0x1], 0  ;;  %s1872_s17 = smov 0   ;;  %s1874_s18 = smov 0  }
  0x10   :  { %s1876_s19 = smov 0   ;;  %s1878_s20 = smov 0  }
  0x11   :  { %s1880_s21 = smov 0   ;;  %s1882_s22 = smov 0  }
  0x12 LB: > { %2151 = sst [smem:[#allocation19_spill]] %s1783_s17  ;;  %s1903_s23 = sadd.s32 4294967295, %s1803_s22   ;;  %s1803_s22 = sphi %s1882_s22, %s32_s22   ;;  %s1799_s21 = sphi %s1880_s21, %s2189_s21   ;;  %s1795_s20 = sphi %s1878_s20, %s2188_s20   ;;  %s1791_s19 = sphi %s1876_s19, %s2184_s19   ;;  %s1787_s18 = sphi %s1874_s18, %s2187_s18   ;;  %s1783_s17 = sphi %s1872_s17, %s2186_s17  }
  0x13   : > { %2152 = sst [smem:[#allocation20_spill]] %s1791_s19  ;;  %p1183_p0 = scmp.ge.s32.totalorder %s1803_s22, 1 }
  0x14   : > { %2153 = sst [smem:[#allocation21_spill]] %s1795_s20  ;;  %p67_p1 = scmp.eq.s32.totalorder %s1903_s23, 0 }
  0x15   : > { %2154 = sst [smem:[#allocation22_spill]] %s1803_s22  ;;  %p325_p2 = scmp.lt.s32.totalorder %s1803_s22, 3 }
  0x16   : > { %s2155_s7 = sld [smem:[#allocation29_spill]]  ;;  %s1805_s28 = smov [#allocation8]  }
  0x17   : > { %p1911_p3 = pnand %p1183_p0, %p325_p2  ;;  %s350_s29 = sshll.u32 %s1805_s28, 4  ;;  %s351_s29 = int_to_ptr.vmem [resolvable:$true] %s350_s29 }
  0x18   : > { %s2132_s12 = smov 128   ;;  %s2133_s13 = smov 8  }
  0x19   : > { %p1425_p4 = pneg %p1911_p3  ;;  %s1182_s14 = sadd.s32 4294967294, %s1803_s22  }
  0x1a   : > { %s44_s15 = sadd.s32 1, %s1799_s21  ;;  %s53_s16 = sadd.s32 1, %s1791_s19 }
  0x1b   : > { %p1919_p5 = pnand %p1425_p4, %p67_p1  ;;  %p46_p7 = scmp.ge.s32.totalorder %s44_s15, 2 }
  0x1c   : > { %s348_s26 = sshll.u32 %s2155_s7, 4  ;;  %p60_p8 = scmp.ne.s32.totalorder %s1791_s19, %s1787_s18  ;;  %s349_s26 = int_to_ptr.hbm [resolvable:$true] %s348_s26 }
  0x1d   : > { %1428 = dma.hbm_to_vmem [thread:$0]  (!%p1919_p5), %s349_s26, 2048, %s351_s29, [#allocation9], %s2132_s12, %s2132_s12, %s2133_s13  }
  0x1e   : > { %p61_p9 = scmp.eq.s32.totalorder %s1803_s22, 0  ;;  %p66_p10 = scmp.ne.s32.totalorder %s1787_s18, %s1783_s17 }
  0x1f   : > { %s2191_s15 = smov (%p46_p7, %s44_s15), 0  ;;  %p312_p13 = scmp.eq.s32.totalorder %s1903_s23, 1 }
  0x20   : > { %2158 = sst [smem:[#allocation23_spill]] %s2191_s15  ;;  %p1939_p11 = por %p61_p9, %p60_p8 }
  0x21   : > { %p1945_p12 = por %p67_p1, %p66_p10  ;;  %s48_s26 = ssub.s32 %s1799_s21, %s2191_s15 }
  0x22   : > { %p51_p0 = scmp.eq.s32.totalorder %s48_s26, 0  ;;  %p318_p2 = scmp.eq.s32.totalorder %s1182_s14, 1 }
  0x23   : > { %p1952_p4 = por %p312_p13, %p60_p8  ;;  %p1452_p7 = scmp.lt.s32.totalorder %s1803_s22, 2 }
  0x24   : > { %s1958_s29 = scalar_select %p51_p0, %s1791_s19, %s53_s16  }
  0x25   : > { %s2161_s28 = scalar_select %p1952_p4, 1, 0 }
  0x26   : > { %2163 = sst [smem:[#allocation25_spill]] %s1958_s29  ;;  %p1960_p9 = por %p318_p2, %p66_p10 }
  0x27   : > { %2162 = sst [smem:[#allocation24_spill]] %s2161_s28  ;;  %s1965_s13 = sand.u32 1, %s1791_s19  }
  0x28   : > { %s2164_s12 = scalar_select %p1960_p9, 1, 0 }
  0x29   : > { %s2143_s7 = sshll.u32 %s1965_s13, 3  ;;  %s1189_s15 = sshll.u32 %s1799_s21, 3 }
  0x2a   : > { %2165 = sst [smem:[#allocation26_spill]] %s2164_s12  ;;  %p1971_p6 = pnand %p1452_p7, %p1939_p11 }
  0x2b   : > { %s415_s26 = sand.u32 1, %s1803_s22   ;;  %s2167_s1 = sld [smem:[#allocation27_spill]] }
  0x2c   : > { %s419_s19 = scalar_lea.vmem [#allocation5], %s2143_s7  ;;  %s1981_s11 = scalar_lea.sflag [#allocation6], %s415_s26 }
  0x2d   : > { %s427_s12 = sshll.u32 %s419_s19, 4  ;;  %s2168_s8 = sld [smem:[#allocation30_spill]]  ;;  %s428_s12 = int_to_ptr.vmem [resolvable:$true] %s427_s12 }
  0x2e   : > { %s1808_s29 = smov [#allocation10]   ;;  %s2169_s9 = sld [smem:[#allocation31_spill]] }
  0x2f   : > { %s364_s16 = sshll.u32 %s1808_s29, 4  ;;  %s2170_s26 = smov 8   ;;  %s365_s16 = int_to_ptr.vmem [resolvable:$true] %s364_s16 }
  0x30   : > { %s1809_s10 = smov [#allocation11]   ;;  %s1811_s24 = smov 4  }
  0x31   : > { %s423_s17 = scalar_lea.hbm %s2167_s1, %s1189_s15  ;;  %s2171_s1 = smov 128  }
  0x32   : > { %s425_s28 = sshll.u32 %s423_s17, 4  ;;  %s404_s17 = scalar_lea.hbm %s2120_s0, %s1189_s15  ;;  %s426_s28 = int_to_ptr.hbm [resolvable:$true] %s425_s28 }
  0x33   : > { %1441 = dma.hbm_to_vmem [thread:$0]  (!%p1971_p6), %s426_s28, 128, %s428_s12, %s1981_s11  }
  0x34   : > { %s362_s22 = sshll.u32 %s2168_s8, 4  ;;  %s376_s19 = sshll.u32 %s2169_s9, 4  ;;  %s363_s22 = int_to_ptr.hbm [resolvable:$true] %s362_s22  ;;  %s377_s19 = int_to_ptr.hbm [resolvable:$true] %s376_s19 }
  0x35   : > { %1431 = dma.hbm_to_vmem [thread:$0]  (!%p1919_p5), %s363_s22, 2048, %s365_s16, [#allocation9], %s2171_s1, %s2171_s1, %s2170_s26  }
  0x36   : > { %s378_s12 = sshll.u32 %s1809_s10, 4  ;;  %s1810_s28 = smov 64   ;;  %s379_s12 = int_to_ptr.vmem [resolvable:$true] %s378_s12 }
  0x37   : > { %1434 = dma.hbm_to_vmem [thread:$0]  (!%p1919_p5), %s377_s19, 1024, %s379_s12, [#allocation12], %s1810_s28, %s1810_s28, %s1811_s24  }
  0x38   : > { %s2172_s8 = sshll.u32 %s1965_s13, 3  ;;  %s406_s1 = sshll.u32 %s404_s17, 4  ;;  %s407_s1 = int_to_ptr.hbm [resolvable:$true] %s406_s1 }
  0x39   : > { %s399_s9 = scalar_lea.vmem [#allocation2], %s2172_s8  ;;  %s396_s22 = scalar_lea.sflag [#allocation3], %s1965_s13 }
  0x3a   : > { %s408_s20 = sshll.u32 %s399_s9, 4  ;;  %s440_s30 = scalar_lea.hbm %s2122_s2, %s1799_s21  ;;  %s409_s20 = int_to_ptr.vmem [resolvable:$true] %s408_s20 }
  0x3b   : > { %1438 = dma.hbm_to_vmem [thread:$0]  (!%p1971_p6), %s407_s1, 128, %s409_s20, %s396_s22  }
  0x3c   : > { %s437_s10 = scalar_lea.vmem [#allocation7], %s1965_s13  ;;  %s442_s19 = sshll.u32 %s440_s30, 4  ;;  %s443_s19 = int_to_ptr.hbm [resolvable:$true] %s442_s19 }
  0x3d   : > { %s444_s4 = sshll.u32 %s437_s10, 4  ;;  %453 = sbr.rel (%p1911_p3) target bundleno = 902 (0x386), region = 64  ;;  %s445_s4 = int_to_ptr.vmem [resolvable:$true] %s444_s4 }
  0x3e   : > { %1444 = dma.hbm_to_vmem [thread:$0]  (!%p1971_p6), %s443_s19, 16, %s445_s4, %s1981_s11  }
  0x3f   : > { %s2018_s8 = sand.u32 (!%p1911_p3), 1, %s1787_s18  }
  0x40   : > { %s2021_s9 = sshll.u32 (!%p1911_p3), %s2018_s8, 3  ;;  %s456_s20 = scalar_lea.sflag (!%p1911_p3), [#allocation3], %s2018_s8 }
  0x41   : > { %s459_s13 = scalar_lea.vmem (!%p1911_p3), [#allocation2], %s2021_s9 }
  0x42   : > { %1762 = dma.done.wait (%p1945_p12), %s456_s20, 128  }
  0x43   : > { %1764 = vsyncadd (%p1945_p12), %s456_s20, 4294967168  ;;  %s465_s4 = sand.u32 1, %s1903_s23   ;;  %s469_s27 = scalar_lea.vmem [#allocation5], %s2021_s9 }
  0x44   : > { %s466_s11 = scalar_lea.sflag [#allocation6], %s465_s4 }
  0x45   : > { %1766 = dma.done.wait (%p1945_p12), %s466_s11, 144  }
  0x46   : > { %1768 = vsyncadd (%p1945_p12), %s466_s11, 4294967152  ;;  %s478_s15 = scalar_lea.vmem [#allocation7], %s2018_s8 }
  0x47   : > { %1770 = dma.done.wait (%p67_p1), [#allocation9], 4096  }
  0x48   : > { %1772 = vsyncadd (%p67_p1), [#allocation9], 4294963200 }
  0x49   : > { %1774 = dma.done.wait (%p67_p1), [#allocation12], 1024  }
  0x4a   : > { %1776 = vsyncadd (%p67_p1), [#allocation12], 4294966272  ;;  %v2044_v0 = vld [vmem:[%s469_s27] sm:$0xff]  ;;  %v2046_v1 = vld [vmem:[%s459_s13] sm:$0xff]  ;;  %s2173_s17 = sld [smem:[#allocation28_spill]]  ;;  %vm893_vm6 = vcmask 1043456  }
  0x4b   : > { %580 = vadd.xlane.f32.xlu0 %v2044_v0  ;;  %548 = vadd.xlane.f32.xlu1 %v2046_v1  ;;  %v583_v2 = vmul.f32 %v2044_v0, %v2044_v0  ;;  %v551_v3 = vmul.f32 %v2046_v1, %v2046_v1  ;;  %v1257_v4 = vld [vmem:[#allocation8 + $0x70] sm:$0xf]  ;;  %v1380_v5 = vld [vmem:[#allocation8 + $0x74] sm:$0xf0]  ;;  %v1379_v6 = vld [vmem:[#allocation8 + $0x74] sm:$0xf] }
  0x4c   : > { %v1258_v7 = vor.u32 %v1380_v5, %v1257_v4  ;;  %v1259_v8 = vld [vmem:[#allocation8 + $0x78] sm:$0xf0]  ;;  %v1321_v9 = vld [vmem:[#allocation10 + $0x70] sm:$0xf]  ;;  %v1396_v10 = vld [vmem:[#allocation10 + $0x74] sm:$0xf0] }
  0x4d   : > { %v1262_v11 = vor.u32 %v1379_v6, %v1259_v8  ;;  %v1322_v12 = vor.u32 %v1396_v10, %v1321_v9  ;;  %v1395_v13 = vld [vmem:[#allocation10 + $0x74] sm:$0xf]  ;;  %v1323_v14 = vld [vmem:[#allocation10 + $0x78] sm:$0xf0]  ;;  %v1249_v16 = vld [vmem:[#allocation8 + $0x60] sm:$0xf] }
  0x4e   : > { %707 = vmatpush.bf16.msra.mxu0 %v1258_v7  ;;  %v1326_v15 = vor.u32 %v1395_v13, %v1323_v14  ;;  %v1378_v17 = vld [vmem:[#allocation8 + $0x64] sm:$0xf0]  ;;  %v1377_v18 = vld [vmem:[#allocation8 + $0x64] sm:$0xf]  ;;  %v1251_v20 = vld [vmem:[#allocation8 + $0x68] sm:$0xf0] }
  0x4f   : > { %720 = vmatpush.bf16.msra.mxu1 %v1262_v11  ;;  %830 = vmatpush.bf16.msra.mxu2 %v1322_v12  ;;  %v1250_v19 = vor.u32 %v1378_v17, %v1249_v16  ;;  %v1313_v21 = vld [vmem:[#allocation10 + $0x60] sm:$0xf]  ;;  %v1394_v22 = vld [vmem:[#allocation10 + $0x64] sm:$0xf0]  ;;  %v1254_v23 = vor.u32 %v1377_v18, %v1251_v20  ;;  %v1393_v25 = vld [vmem:[#allocation10 + $0x64] sm:$0xf] }
  0x50   : > { %843 = vmatpush.bf16.msra.mxu3 %v1326_v15  ;;  %v1314_v24 = vor.u32 %v1394_v22, %v1313_v21  ;;  %v1315_v26 = vld [vmem:[#allocation10 + $0x68] sm:$0xf0]  ;;  %v1241_v28 = vld [vmem:[#allocation8 + $0x50] sm:$0xf]  ;;  %v1376_v29 = vld [vmem:[#allocation8 + $0x54] sm:$0xf0] }
  0x51   : > { %v1318_v27 = vor.u32 %v1393_v25, %v1315_v26  ;;  %v1375_v30 = vld [vmem:[#allocation8 + $0x54] sm:$0xf]  ;;  %v1242_v31 = vor.u32 %v1376_v29, %v1241_v28  ;;  %v1243_v32 = vld [vmem:[#allocation8 + $0x58] sm:$0xf0]  ;;  %v1305_v33 = vld [vmem:[#allocation10 + $0x50] sm:$0xf] }
  0x52   : > { %708 = vmatpush.bf16.msra.mxu0 %v1250_v19  ;;  %v1392_v34 = vld [vmem:[#allocation10 + $0x54] sm:$0xf0]  ;;  %v1246_v35 = vor.u32 %v1375_v30, %v1243_v32  ;;  %v1391_v37 = vld [vmem:[#allocation10 + $0x54] sm:$0xf]  ;;  %v1307_v38 = vld [vmem:[#allocation10 + $0x58] sm:$0xf0] }
  0x53   : > { %584 = vadd.xlane.f32.xlu0 %v583_v2  ;;  %552 = vadd.xlane.f32.xlu1 %v551_v3  ;;  %v1306_v36 = vor.u32 %v1392_v34, %v1305_v33  ;;  %v1310_v39 = vor.u32 %v1391_v37, %v1307_v38  ;;  %v1233_v40 = vld [vmem:[#allocation8 + $0x40] sm:$0xf]  ;;  %v1374_v41 = vld [vmem:[#allocation8 + $0x44] sm:$0xf0]  ;;  %v1373_v42 = vld [vmem:[#allocation8 + $0x44] sm:$0xf] }
  0x54   : > { %721 = vmatpush.bf16.msra.mxu1 %v1254_v23  ;;  %831 = vmatpush.bf16.msra.mxu2 %v1314_v24  ;;  %v1234_v43 = vor.u32 %v1374_v41, %v1233_v40  ;;  %v1235_v44 = vld [vmem:[#allocation8 + $0x48] sm:$0xf0]  ;;  %v1297_v45 = vld [vmem:[#allocation10 + $0x40] sm:$0xf]  ;;  %v1390_v46 = vld [vmem:[#allocation10 + $0x44] sm:$0xf0] }
  0x55   : > { %844 = vmatpush.bf16.msra.mxu3 %v1318_v27  ;;  %v1238_v47 = vor.u32 %v1373_v42, %v1235_v44  ;;  %v1298_v48 = vor.u32 %v1390_v46, %v1297_v45  ;;  %v1389_v49 = vld [vmem:[#allocation10 + $0x44] sm:$0xf]  ;;  %v1299_v50 = vld [vmem:[#allocation10 + $0x48] sm:$0xf0]  ;;  %v1225_v52 = vld [vmem:[#allocation8 + $0x30] sm:$0xf] }
  0x56   : > { %709 = vmatpush.bf16.msra.mxu0 %v1242_v31  ;;  %v1302_v51 = vor.u32 %v1389_v49, %v1299_v50  ;;  %v1372_v53 = vld [vmem:[#allocation8 + $0x34] sm:$0xf0]  ;;  %v1371_v54 = vld [vmem:[#allocation8 + $0x34] sm:$0xf]  ;;  %v1227_v56 = vld [vmem:[#allocation8 + $0x38] sm:$0xf0] }
  0x57   : > { %v1226_v55 = vor.u32 %v1372_v53, %v1225_v52  ;;  %v1289_v57 = vld [vmem:[#allocation10 + $0x30] sm:$0xf]  ;;  %v1388_v58 = vld [vmem:[#allocation10 + $0x34] sm:$0xf0]  ;;  %v1230_v59 = vor.u32 %v1371_v54, %v1227_v56  ;;  %v1387_v61 = vld [vmem:[#allocation10 + $0x34] sm:$0xf] }
  0x58   : > { %722 = vmatpush.bf16.msra.mxu1 %v1246_v35  ;;  %832 = vmatpush.bf16.msra.mxu2 %v1306_v36  ;;  %v1290_v60 = vor.u32 %v1388_v58, %v1289_v57  ;;  %v1291_v62 = vld [vmem:[#allocation10 + $0x38] sm:$0xf0]  ;;  %v1217_v2 = vld [vmem:[#allocation8 + $0x20] sm:$0xf]  ;;  %v1370_v3 = vld [vmem:[#allocation8 + $0x24] sm:$0xf0] }
  0x59   : > { %845 = vmatpush.bf16.msra.mxu3 %v1310_v39  ;;  %v1294_v63 = vor.u32 %v1387_v61, %v1291_v62  ;;  %v1369_v4 = vld [vmem:[#allocation8 + $0x24] sm:$0xf]  ;;  %v1218_v5 = vor.u32 %v1370_v3, %v1217_v2  ;;  %v1219_v6 = vld [vmem:[#allocation8 + $0x28] sm:$0xf0]  ;;  %v1281_v7 = vld [vmem:[#allocation10 + $0x20] sm:$0xf] }
  0x5a   : > { %710 = vmatpush.bf16.msra.mxu0 %v1234_v43  ;;  %v1386_v8 = vld [vmem:[#allocation10 + $0x24] sm:$0xf0]  ;;  %v1222_v9 = vor.u32 %v1369_v4, %v1219_v6  ;;  %v1385_v11 = vld [vmem:[#allocation10 + $0x24] sm:$0xf]  ;;  %v1283_v12 = vld [vmem:[#allocation10 + $0x28] sm:$0xf0] }
  0x5b   : > { %v1282_v10 = vor.u32 %v1386_v8, %v1281_v7  ;;  %v1209_v13 = vld [vmem:[#allocation8 + $0x10] sm:$0xf]  ;;  %v1286_v14 = vor.u32 %v1385_v11, %v1283_v12  ;;  %v1368_v15 = vld [vmem:[#allocation8 + $0x14] sm:$0xf0]  ;;  %v1367_v16 = vld [vmem:[#allocation8 + $0x14] sm:$0xf] }
  0x5c   : > { %723 = vmatpush.bf16.msra.mxu1 %v1238_v47  ;;  %833 = vmatpush.bf16.msra.mxu2 %v1298_v48  ;;  %v1211_v17 = vld [vmem:[#allocation8 + $0x18] sm:$0xf0]  ;;  %v1210_v20 = vor.u32 %v1368_v15, %v1209_v13  ;;  %v1273_v22 = vld [vmem:[#allocation10 + $0x10] sm:$0xf]  ;;  %v1384_v23 = vld [vmem:[#allocation10 + $0x14] sm:$0xf0] }
  0x5d   : > { %846 = vmatpush.bf16.msra.mxu3 %v1302_v51  ;;  %v1214_v21 = vor.u32 %v1367_v16, %v1211_v17  ;;  %v1383_v24 = vld [vmem:[#allocation10 + $0x14] sm:$0xf]  ;;  %v1274_v26 = vor.u32 %v1384_v23, %v1273_v22  ;;  %v1275_v27 = vld [vmem:[#allocation10 + $0x18] sm:$0xf0]  ;;  %v1201_v28 = vld [vmem:[#allocation8] sm:$0xf] }
  0x5e   : > { %711 = vmatpush.bf16.msra.mxu0 %v1226_v55  ;;  %v1278_v29 = vor.u32 %v1383_v24, %v1275_v27  ;;  %v1366_v30 = vld [vmem:[#allocation8 + $0x4] sm:$0xf0]  ;;  %v1365_v31 = vld [vmem:[#allocation8 + $0x4] sm:$0xf]  ;;  %v1203_v32 = vld [vmem:[#allocation8 + $0x8] sm:$0xf0] }
  0x5f   : > { %v1265_v33 = vld [vmem:[#allocation10] sm:$0xf]  ;;  %v1382_v34 = vld [vmem:[#allocation10 + $0x4] sm:$0xf0]  ;;  %v1381_v35 = vld [vmem:[#allocation10 + $0x4] sm:$0xf]  ;;  %v1202_v36 = vor.u32 %v1366_v30, %v1201_v28  ;;  %v1206_v37 = vor.u32 %v1365_v31, %v1203_v32 }
  0x60   : > { %724 = vmatpush.bf16.msra.mxu1 %v1230_v59  ;;  %834 = vmatpush.bf16.msra.mxu2 %v1290_v60  ;;  %v1266_v38 = vor.u32 %v1382_v34, %v1265_v33  ;;  %v1267_v39 = vld [vmem:[#allocation10 + $0x8] sm:$0xf0]  ;;  %v1514_v3 = vld [vmem:[%s2125_s5] ss:$0 sm:$0xff]  ;;  %vm878_vm7 = vcmask 64512   ;;  %s2174_s1 = sld [smem:[#allocation21_spill]] }
  0x61   : > { %847 = vmatpush.bf16.msra.mxu3 %v1294_v63  ;;  %v1270_v41 = vor.u32 %v1381_v35, %v1267_v39  ;;  %v545_v28 = vld [vmem:[%s478_s15] sm:$0x1]  ;;  %v1402_v39 = vld [vmem:[#allocation11 + $0x28] sm:$0xff]  ;;  %s2175_s26 = sld [smem:[#allocation32_spill]]  ;;  %s541_s27 = scalar_lea.vmem [#allocation13], %s2021_s9 }
  0x62   : > { %712 = vmatpush.bf16.msra.mxu0 %v1218_v5  ;;  %v1512_v5 = vld [vmem:[%s2123_s3] ss:$0 sm:$0xff]  ;;  %s2176_s20 = sld [smem:[#allocation33_spill]]  ;;  %s1030_s15 = sshll.u32 %s541_s27, 4  ;;  %s1031_s15 = int_to_ptr.vmem [resolvable:$true] %s1030_s15 }
  0x63   : > { %s1017_s25 = scalar_lea.sflag [#allocation4], %s2018_s8 }
  0x64   : > { %725 = vmatpush.bf16.msra.mxu1 %v1222_v9  ;;  %835 = vmatpush.bf16.msra.mxu2 %v1282_v10  ;;  %v1513_v10 = vld [vmem:[%s2173_s17] ss:$0 sm:$0xff] }
  0x65   : > { %848 = vmatpush.bf16.msra.mxu3 %v1286_v14 }
  0x66   : > { %713 = vmatpush.bf16.msra.mxu0 %v1210_v20  ;;  %s1362_s30 = sshll.u32 %s2174_s1, 3 }
  0x68   : > { %726 = vmatpush.bf16.msra.mxu1 %v1214_v21  ;;  %836 = vmatpush.bf16.msra.mxu2 %v1274_v26  ;;  %s2177_s13 = smov %s2176_s20  ;;  %s1028_s4 = scalar_lea.hbm %s2176_s20, %s1362_s30 }
  0x69   : > { %849 = vmatpush.bf16.msra.mxu3 %v1278_v29  ;;  %v856_v29 = vsub.f32 1.0, %v545_v28  ;;  %s1032_s23 = sshll.u32 %s1028_s4, 4  ;;  %s1729_s9 = scalar_lea.hbm %s2177_s13, 16  ;;  %s1033_s23 = int_to_ptr.hbm [resolvable:$true] %s1032_s23 }
  0x6a   : > { %714 = vmatpush.bf16.msra.mxu0 %v1202_v36  ;;  %s1723_s14 = sshra.s32 %s1033_s23, 4  ;;  %s1724_s14 = int_to_ptr.hbm [resolvable:$true] %s1723_s14 }
  0x6b   : > { %v857_v30 = vmul.f32 -1e+09, %v856_v29  ;;  %s1725_s12 = scalar_lea.hbm %s1724_s14, 8  ;;  %p1730_p6 = scmp.lt.s32.totalorder %s1724_s14, %s2177_s13 }
  0x6c   : > { %727 = vmatpush.bf16.msra.mxu1 %v1206_v37  ;;  %837 = vmatpush.bf16.msra.mxu2 %v1266_v38  ;;  %v1404_v37 = vld [vmem:[#allocation11 + $0x38] sm:$0xff]  ;;  %v1403_v38 = vld [vmem:[#allocation11 + $0x30] sm:$0xff]  ;;  %p1726_p1 = scmp.ne.s32.totalorder %s1724_s14, %s1725_s12  ;;  %p1731_p8 = scmp.lt.s32.totalorder %s1729_s9, %s1725_s12 }
  0x6d   : > { %850 = vmatpush.bf16.msra.mxu3 %v1270_v41  ;;  %v875_v31 = vperm.slane %v857_v30, 0 }
  0x6e   : > { %p1727_p3 = pnand %p1726_p1, %p1952_p4  ;;  %p1732_p10 = por %p1731_p8, %p1730_p6 }
  0x70   : > { %977 = vmatpush.bf16.msrb.mxu2 %v1404_v37  ;;  %p1728_p5 = pneg %p1727_p3 }
  0x72   : > { %p1733_p11 = pnand %p1732_p10, %p1728_p5 }
  0x74   : > { %978 = vmatpush.bf16.msrb.mxu2 %v1403_v38 }
  0x78   : > { %979 = vmatpush.bf16.msrb.mxu2 %v1402_v39 }
  0xbe   : > { %v581_v18 = vpop.xlane.xlu0 %580  ;;  %v549_v19 = vpop.xlane.xlu1 %548 }
  0xbf   : > { %v2054_v25 = vmul.f32 0.03125, %v549_v19  ;;  %v582_v40 = vmul.f32 0.03125, %v581_v18 }
  0xc1   : > { %v555_v42 = vmul.f32 %v2054_v25, %v2054_v25  ;;  %v587_v45 = vmul.f32 %v582_v40, %v582_v40  ;;  %v589_v63 = vsub.f32 %v2044_v0, %v582_v40  ;;  %v557_v4 = vsub.f32 %v2046_v1, %v2054_v25  ;;  %v1515_v0 = vld [vmem:[%s2126_s6] ss:$0 sm:$0xff]  ;;  %v1401_v40 = vld [vmem:[#allocation11 + $0x20] sm:$0xff] }
  0xc2   : > { %980 = vmatpush.bf16.msrb.mxu2 %v1401_v40 }
  0xc6   : > { %v585_v43 = vpop.xlane.xlu0 %584  ;;  %v553_v44 = vpop.xlane.xlu1 %552 }
  0xc7   : > { %v586_v46 = vmul.f32 0.03125, %v585_v43  ;;  %v554_v47 = vmul.f32 0.03125, %v553_v44 }
  0xc9   : > { %v588_v48 = vsub.f32 %v586_v46, %v587_v45  ;;  %v556_v49 = vsub.f32 %v554_v47, %v555_v42  ;;  %v1400_v47 = vld [vmem:[#allocation11 + $0x18] sm:$0xff] }
  0xca   : > { %981 = vmatpush.bf16.msrb.mxu2 %v1400_v47 }
  0xcb   : > { %v590_v50 = vadd.f32 1e-05, %v588_v48  ;;  %v558_v51 = vadd.f32 1e-05, %v556_v49  ;;  %v1399_v48 = vld [vmem:[#allocation11 + $0x10] sm:$0xff]  ;;  %v1398_v49 = vld [vmem:[#allocation11 + $0x8] sm:$0xff] }
  0xcd   : > { %1517 = vrsqrt.f32 %v590_v50  ;;  %vm565_vm1 = vweird.f32 %v558_v51  ;;  %vm597_vm3 = vweird.f32 %v590_v50 }
  0xce   : > { %1519 = vrsqrt.f32 %v558_v51  ;;  %982 = vmatpush.bf16.msrb.mxu2 %v1399_v48 }
  0xd2   : > { %983 = vmatpush.bf16.msrb.mxu2 %v1398_v49 }
  0xd3   : > { %v1518_v52 = vpop.eup %1517 }
  0xd4   : > { %v1520_v53 = vpop.eup %1519  ;;  %v592_v54 = vmul.f32 %v1518_v52, %v590_v50  ;;  %vm598_vm0 = vweird.f32 %v1518_v52  ;;  %v1397_v50 = vld [vmem:[#allocation11] sm:$0xff] }
  0xd5   : > { %v560_v55 = vmul.f32 %v1520_v53, %v558_v51  ;;  %vm566_vm2 = vweird.f32 %v1520_v53  ;;  %vm599_vm4 = vmor %vm597_vm3, %vm598_vm0 }
  0xd6   : > { %v593_v56 = vmul.f32 %v1518_v52, %v592_v54  ;;  %vm567_vm5 = vmor %vm565_vm1, %vm566_vm2  ;;  %984 = vmatpush.bf16.msrb.mxu2 %v1397_v50 }
  0xd7   : > { %v561_v57 = vmul.f32 %v1520_v53, %v560_v55 }
  0xd8   : > { %v594_v58 = vmul.f32 0.5, %v593_v56 }
  0xd9   : > { %v562_v59 = vmul.f32 0.5, %v561_v57  ;;  %v1516_v57 = vld [vmem:[%s2175_s26] ss:$0 sm:$0xff] }
  0xda   : > { %v595_v60 = vsub.f32 1.5, %v594_v58 }
  0xdb   : > { %v563_v61 = vsub.f32 1.5, %v562_v59 }
  0xdc   : > { %v596_v62 = vmul.f32 %v1518_v52, %v595_v60 }
  0xdd   : > { %v564_v2 = vmul.f32 %v1520_v53, %v563_v61 }
  0xde   : > { %v600_v6 = vsel %vm599_vm4, %v1518_v52, %v596_v62 }
  0xdf   : > { %v568_v7 = vsel %vm567_vm5, %v1520_v53, %v564_v2  ;;  %v601_v8 = vmul.f32 %v600_v6, %v589_v63 }
  0xe0   : > { %v569_v9 = vmul.f32 %v568_v7, %v557_v4 }
  0xe1   : > { %v605_v11 = vmul.f32 %v1514_v3, %v601_v8 }
  0xe2   : > { %v573_v12 = vmul.f32 %v1512_v5, %v569_v9 }
  0xe3   : > { %v609_v1 = vadd.f32 %v1515_v0, %v605_v11 }
  0xe4   : > { %v577_v13 = vadd.f32 %v1513_v10, %v573_v12 }
  0xe5   : > { %v733_v14 = vpack.c.bf16 %v609_v1, %v609_v1 }
  0xe6   : > { %v610_v15 = vpack.c.bf16 %v577_v13, %v577_v13 }
  0xe7   : > { %838 = vmatmul.bf16.vlgmr.msra.gmra.mxu2 %v733_v14  ;;  %851 = vmatmul.bf16.vlgmr.msra.gmra.mxu3 %v733_v14 }
  0xe8   : > { %715 = vmatmul.bf16.vlgmr.msra.gmra.mxu0 %v610_v15  ;;  %728 = vmatmul.bf16.vlgmr.msra.gmra.mxu1 %v610_v15 }
 0x165   : > { %v716_v16 = vpop.f32.mrf.mxu0  ;;  %v729_v17 = vpop.f32.mrf.mxu1 }
 0x166   : > { %v858_v25 = vpack.c.bf16 %v716_v16, %v716_v16  ;;  %v994_v58 = vadd.f32 %v1516_v57, %v729_v17 }
 0x168   : > { %v1360_v59 = vmul.f32 -1.442695, %v994_v58 }
 0x16a   : > { %v839_v18 = vpop.f32.mrf.mxu2  ;;  %v852_v19 = vpop.f32.mrf.mxu3 }
 0x16b   : > { %v859_v20 = vpack.c.bf16 %v839_v18, %v839_v18  ;;  %v889_v21 = vpack.c.bf16 %v852_v19, %v852_v19 }
 0x16d   : > { %v718_v22 = vpop.f32.mrf.mxu0  ;;  %v731_v23 = vpop.f32.mrf.mxu1  ;;  %867 = vmatpush.bf16.xpose.msrb.mxu0 %v859_v20  ;;  %v895_v24 = vsel %vm893_vm6, %v889_v21, 0 }
 0x16e   : > { %904 = vmatpush.bf16.msrb.mxu1 %v895_v24 }
 0x172   : > { %v841_v26 = vpop.f32.mrf.mxu2  ;;  %v854_v27 = vpop.f32.mrf.mxu3 }
 0x174   : > { %868 = vmatmul.bf16.vlgmr.msrb.gmra.mxu0 %v858_v25 }
 0x1f1   : > { %v869_v32 = vpop.f32.mrf.mxu0 }
 0x1f2   : > { %v873_v33 = vmul.f32 0.17677669, %v869_v32 }
 0x1f4   : > { %v877_v34 = vadd.f32 %v875_v31, %v873_v33 }
 0x1f6   : > { %v879_v35 = vsel %vm878_vm7, %v877_v34, -inf }
 0x1f7   : > { %880 = vmax.xlane.f32.xlu2 %v879_v35 }
 0x1f9   : > { %v871_v36 = vpop.f32.mrf.mxu0 }
 0x26a   : > { %v881_v41 = vpop.xlane.xlu2 %880 }
 0x26b   : > { %v882_v42 = vsub.f32 %v877_v34, %v881_v41 }
 0x26d   : > { %v883_v43 = vmul.f32 1.442695, %v882_v42 }
 0x26f   : > { %1521 = vpow2.f32 %v883_v43 }
 0x275   : > { %v1522_v44 = vpop.eup %1521 }
 0x276   : > { %v885_v45 = vsel %vm878_vm7, %v1522_v44, 0.0  ;;  %v888_v46 = vpack.c.bf16 %v1522_v44, %v1522_v44 }
 0x277   : > { %886 = vadd.xlane.f32.xlu2 %v885_v45 }
 0x278   : > { %1327 = vmatmul.msk.bf16.vlgmr.msrb.gmra.mxu1 %vm878_vm7, %v888_v46 }
 0x2ea   : > { %v887_v51 = vpop.xlane.xlu2 %886 }
 0x2eb   : > { %1523 = vrcp.f32 %v887_v51 }
 0x2ec   : > { %1525 = vpow2.f32 %v1360_v59 }
 0x2f1   : > { %v1524_v52 = vpop.eup %1523 }
 0x2f2   : > { %v1526_v60 = vpop.eup %1525 }
 0x2f3   : > { %v998_v61 = vadd.f32 1.0, %v1526_v60 }
 0x2f5   : > { %v906_v53 = vpop.f32.mrf.mxu1  ;;  %1527 = vrcp.f32 %v998_v61  ;;  %v1010_v5 = vand.u32 2147483648, %v998_v61  ;;  %vm1004_vm9 = vweird.f32 %v998_v61  ;;  %v1008_v6 = vand.u32 2147483647, %v998_v61 }
 0x2f6   : > { %v911_v54 = vmul.f32 %v1524_v52, %v906_v53 }
 0x2f7   : > { %v1011_v8 = vor.u32 1.1754944e-38, %v1010_v5  ;;  %vm1009_vm11 = vcmp.eq.f32.partialorder %v1008_v6, 8.507059e+37 }
 0x2f8   : > { %v912_v55 = vpack.c.bf16 %v911_v54, %v911_v54 }
 0x2fa   : > { %985 = vmatmul.bf16.vlgmr.msrb.gmra.mxu2 %v912_v55 }
 0x2fb   : > { %v1528_v62 = vpop.eup %1527 }
 0x2fc   : > { %v1000_v63 = vmul.f32 %v1528_v62, %v998_v61  ;;  %vm1005_vm8 = vweird.f32 %v1528_v62 }
 0x2fd   : > { %v908_v56 = vpop.f32.mrf.mxu1  ;;  %vm1006_vm10 = vmor %vm1004_vm9, %vm1005_vm8 }
 0x2fe   : > { %v1001_v2 = vsub.f32 1.0, %v1000_v63 }
 0x300   : > { %v1002_v3 = vmul.f32 %v1528_v62, %v1001_v2 }
 0x302   : > { %v1003_v4 = vadd.f32 %v1528_v62, %v1002_v3 }
 0x304   : > { %v1007_v7 = vsel %vm1006_vm10, %v1528_v62, %v1003_v4 }
 0x305   : > { %v1012_v9 = vsel %vm1009_vm11, %v1011_v8, %v1007_v7 }
 0x37d   : > { %v986_v0 = vpop.f32.mrf.mxu2 }
 0x37e   : > { %v1014_v10 = vmul.f32 %v1012_v9, %v986_v0 }
 0x380   : > { %1015 = vst [vmem:[%s541_s27] sm:$0xff] %v1014_v10 }
 0x381   : > { %1736 = shalt.err (!%p1733_p11)
}
 0x382   : > { %1423 = dma.vmem_to_hbm [thread:$0]  (%p1952_p4), %s1031_s15, 128, %s1033_s23, %s1017_s25  }
 0x385   : > { %v988_v11 = vpop.f32.mrf.mxu2 }
 0x386 PF: > { %s2179_s8 = sld [smem:[#allocation19_spill]] }
 0x387   : > { %s2181_s1 = sld [smem:[#allocation22_spill]] }
 0x38c   : > { %s1044_s22 = sand.u32 1, %s2179_s8  }
 0x38d   : > { %p2182_p12 = scmp.ge.s32.totalorder %s2181_s1, 2  ;;  %s1045_s16 = scalar_lea.sflag [#allocation4], %s1044_s22 }
 0x38f   : > { %p1446_p13 = pnand %p2182_p12, %p1960_p9 }
 0x391   : > { %p1447_p0 = pneg %p1446_p13 }
 0x393   : > { %1778 = dma.done.wait (%p1447_p0), %s1045_s16, 128  }
 0x394   : > { %1780 = vsyncadd (%p1447_p0), %s1045_s16, 4294967168  ;;  %s32_s22 = sadd.s32 1, %s2181_s1   ;;  %s2183_s26 = sld [smem:[#allocation20_spill]] }
 0x395   : > { %p29_p2 = scmp.ge.s32.totalorder %s32_s22, 4   ;;  %s2184_s19 = sld [smem:[#allocation25_spill]] }
 0x396   : > { %s2185_s30 = sld [smem:[#allocation23_spill]]  ;;  %s2186_s17 = smov %s1787_s18 }
 0x397   : > { %s2188_s20 = smov %s1799_s21 }
 0x398   :  { %31 = sbr.rel (!%p29_p2) target bundleno = 18 (0x12), region = 145 }
 0x39a   : > { %s2187_s18 = smov %s2183_s26 }
 0x39c   : > { %s2189_s21 = smov %s2185_s30 }
 0x39d   :  { %1051 = vsyncpa [#allocation3], 1 }
 0x39e   :  { %1053 = vsyncpa [#allocation3 + $0x1], 1 }
 0x39f   :  { %1054 = vsyncpa [#allocation6], 1 }
 0x3a0   :  { %1056 = vsyncpa [#allocation6 + $0x1], 1 }
 0x3a1   :  { %1057 = vsyncpa [#allocation9], 1 }
 0x3a2   :  { %1058 = vsyncpa [#allocation12], 1 }
 0x3a3   :  { %1059 = vsyncpa [#allocation4], 1 }
 0x3a4   :  { %1061 = vsyncpa [#allocation4 + $0x1], 1 }

</bundles_post_ra>
